<compile_context>
chip_gen: v6e
topology: v6e:2x2x1
jax: 0.10.0
libtpu: 0.0.40
codegen_flags: <defaults>
</compile_context>

<pallas_src>
import math
import functools

import jax
import jax.numpy as jnp
from jax import lax
from jax.experimental import pallas as pl
from jax.experimental.pallas import tpu as pltpu

LN_EPS = 1e-5
_INV_SQRT2 = 1.0 / math.sqrt(2.0)


def _mlp_block_kernel(x_ref, w_ref, p_ref, o_ref, *, d_out_true: int):
    # ---- Linear: y = x @ W + b (MXU, f32 accumulation; operands stay in the
    #      dtype they were handed in, so bf16 inputs hit the fast MXU path) ----
    y = jnp.dot(x_ref[...], w_ref[...], preferred_element_type=jnp.float32)

    p = p_ref[...]                      # (3, D_pad) f32: [bias, gamma, beta]
    y = y + p[0:1, :]                   # padded lanes stay exactly 0

    # ---- LayerNorm over the true D_out lanes, one-pass statistics.
    #      Padded lanes of y are exactly 0 (zero W columns + zero bias), so
    #      plain sums divided by the true width give exact mean / variance. ----
    inv_n = jnp.float32(1.0 / d_out_true)
    s1 = jnp.sum(y, axis=-1, keepdims=True)
    s2 = jnp.sum(y * y, axis=-1, keepdims=True)
    mean = s1 * inv_n
    var = s2 * inv_n - mean * mean      # biased variance (matches nn.LayerNorm)
    inv_std = lax.rsqrt(var + LN_EPS)
    y_norm = (y - mean) * inv_std
    y_norm = y_norm * p[1:2, :] + p[2:3, :]   # gamma/beta pads are 0 -> pads stay 0

    # ---- GELU (exact erf form: matches torch nn.GELU() default) ----
    # TODO(synk): switch to tanh/EUP formulation if approximate GELU is acceptable.
    out = 0.5 * y_norm * (1.0 + lax.erf(y_norm * _INV_SQRT2))

    o_ref[...] = out.astype(o_ref.dtype)


def _round_up(v, m):
    return (v + m - 1) // m * m


@functools.partial(jax.jit, static_argnames=("block_m", "matmul_dtype"))
def mlp_block(x, w, b, gamma, beta, *, block_m=256, matmul_dtype=None):
    """Fused Linear -> LayerNorm -> GELU.

    x: (B, D_in); w: (D_in, D_out) (pre-transposed vs torch nn.Linear.weight);
    b/gamma/beta: (D_out,). Returns (B, D_out) in x.dtype.
    `matmul_dtype` (e.g. jnp.bfloat16) optionally narrows the MXU operands;
    accumulation and the LN/GELU tail remain f32.
    """
    B, D_in = x.shape
    D_out = w.shape[1]
    D_pad = _round_up(D_out, 128)            # lane-dense output stores
    pad_w = D_pad - D_out

    # Row-tile size: block_m must be a multiple of 8; bm == B is always legal.
    bm = min(block_m, B)
    grid = (pl.cdiv(B, bm),)

    # Optional low-precision MXU operands.
    x_mm = x if matmul_dtype is None else x.astype(matmul_dtype)
    w_mm = w if matmul_dtype is None else w.astype(matmul_dtype)
    if pad_w:
        w_mm = jnp.pad(w_mm, ((0, 0), (0, pad_w)))

    # Fused (3, D_pad) f32 parameter block: [bias, gamma, beta], zero-padded.
    params = jnp.stack([
        jnp.pad(b.astype(jnp.float32), (0, pad_w)),
        jnp.pad(gamma.astype(jnp.float32), (0, pad_w)),
        jnp.pad(beta.astype(jnp.float32), (0, pad_w)),
    ], axis=0)

    kernel = functools.partial(_mlp_block_kernel, d_out_true=D_out)

    out_padded = pl.pallas_call(
        kernel,
        out_shape=jax.ShapeDtypeStruct((B, D_pad), x.dtype),
        grid_spec=pl.GridSpec(
            grid=grid,
            in_specs=[
                pl.BlockSpec((bm, D_in), lambda i: (i, 0)),     # x: row tiles (pipelined)
                pl.BlockSpec((D_in, D_pad), lambda i: (0, 0)),  # W: VMEM-resident
                pl.BlockSpec((3, D_pad), lambda i: (0, 0)),     # bias/gamma/beta
            ],
            out_specs=pl.BlockSpec((bm, D_pad), lambda i: (i, 0)),
        ),
        compiler_params=pltpu.CompilerParams(
            dimension_semantics=("parallel",)),  # megacore sharding on v7x
    )(x_mm, w_mm, params)

    return out_padded[:, :D_out] if pad_w else out_padded


if __name__ == "__main__":
    key = jax.random.PRNGKey(0)
    k_x, k_w, k_b = jax.random.split(key, 3)

    B, D_in, D_out = 8, 32, 64

    x = jax.random.normal(k_x, (B, D_in), dtype=jnp.float32)

    # Deterministic parameter init (PyTorch-Linear-like uniform bound; synthetic)
    bound = 1.0 / math.sqrt(D_in)
    w = jax.random.uniform(k_w, (D_in, D_out), jnp.float32, -bound, bound)
    b = jax.random.uniform(k_b, (D_out,), jnp.float32, -bound, bound)
    gamma = jnp.ones((D_out,), jnp.float32)   # nn.LayerNorm default weight
    beta = jnp.zeros((D_out,), jnp.float32)   # nn.LayerNorm default bias

    # Plain-JAX reference (f32)
    y_ref = x @ w + b
    mu = y_ref.mean(-1, keepdims=True)
    var = ((y_ref - mu) ** 2).mean(-1, keepdims=True)
    y_ln = (y_ref - mu) / jnp.sqrt(var + LN_EPS) * gamma + beta
    ref = 0.5 * y_ln * (1.0 + lax.erf(y_ln / math.sqrt(2.0)))

    # f32 path: matches torch defaults, tight tolerance.
    out = mlp_block(x, w, b, gamma, beta)
    jax.block_until_ready(out)
    assert out.shape == (B, D_out)
    assert jnp.allclose(out, ref, atol=1e-5, rtol=1e-5), "f32 mismatch vs reference"

    # bf16-operand MXU path (f32 accumulation): exercise the fast MXU path.
    out_bf16 = mlp_block(x, w, b, gamma, beta, matmul_dtype=jnp.bfloat16)
    jax.block_until_ready(out_bf16)
    assert jnp.allclose(out_bf16, ref, atol=1e-1, rtol=1e-1), "bf16 mismatch vs reference"

    print("KERNEL_OK")
</pallas_src>

<mosaic_0001>
module attributes {stable_mosaic.version = 11 : i64} {
  func.func @_mlp_block_kernel(%arg0: i32, %arg1: memref<8x32xf32, #tpu.memory_space<vmem>>, %arg2: memref<32x128xf32, #tpu.memory_space<vmem>>, %arg3: memref<3x128xf32, #tpu.memory_space<vmem>>, %arg4: memref<8x128xf32, #tpu.memory_space<vmem>>) attributes {dimension_semantics = [#tpu.dimension_semantics<parallel>], iteration_bounds = array<i64: 1>, scalar_prefetch = 0 : i64, scratch_operands = 0 : i64, tpu.core_type = #tpu.core_type<tc>, window_params = [{transform_indices = @transform_0, window_bounds = array<i64: 8, 32>}, {pipeline_mode = #tpu.pipeline_mode<synchronous>, transform_indices = @transform_1, window_bounds = array<i64: 32, 128>}, {pipeline_mode = #tpu.pipeline_mode<synchronous>, transform_indices = @transform_2, window_bounds = array<i64: 3, 128>}, {transform_indices = @transform_3, window_bounds = array<i64: 8, 128>}]} {
    %c0 = arith.constant 0 : index
    %c0_0 = arith.constant 0 : index
    %0 = vector.load %arg1[%c0, %c0_0] : memref<8x32xf32, #tpu.memory_space<vmem>>, vector<8x32xf32>
    %c0_1 = arith.constant 0 : index
    %c0_2 = arith.constant 0 : index
    %1 = vector.load %arg2[%c0_1, %c0_2] : memref<32x128xf32, #tpu.memory_space<vmem>>, vector<32x128xf32>
    %cst = arith.constant dense<0.000000e+00> : vector<8x128xf32>
    %2 = tpu.matmul %0, %1, %cst {dimension_numbers = #tpu.dot_dimension_numbers<[1], [0], [0], [1], [0, 0, 1, 1], [], []>} : vector<8x32xf32>, vector<32x128xf32>, vector<8x128xf32> -> vector<8x128xf32>
    %c0_3 = arith.constant 0 : index
    %c0_4 = arith.constant 0 : index
    %3 = vector.load %arg3[%c0_3, %c0_4] : memref<3x128xf32, #tpu.memory_space<vmem>>, vector<3x128xf32>
    %4 = vector.extract_strided_slice %3 {offsets = [0, 0], sizes = [1, 128], strides = [1, 1]} : vector<3x128xf32> to vector<1x128xf32>
    %5 = vector.broadcast %4 : vector<1x128xf32> to vector<8x128xf32>
    %6 = arith.addf %2, %5 : vector<8x128xf32>
    %cst_5 = arith.constant dense<0.000000e+00> : vector<8xf32>
    %7 = vector.multi_reduction <add>, %6, %cst_5 [1] : vector<8x128xf32> to vector<8xf32>
    %8 = vector.shape_cast %7 : vector<8xf32> to vector<8x1xf32>
    %9 = arith.mulf %6, %6 : vector<8x128xf32>
    %cst_6 = arith.constant dense<0.000000e+00> : vector<8xf32>
    %10 = vector.multi_reduction <add>, %9, %cst_6 [1] : vector<8x128xf32> to vector<8xf32>
    %11 = vector.shape_cast %10 : vector<8xf32> to vector<8x1xf32>
    %cst_7 = arith.constant 1.562500e-02 : f32
    %12 = vector.broadcast %cst_7 : f32 to vector<8x1xf32>
    %13 = arith.mulf %8, %12 : vector<8x1xf32>
    %cst_8 = arith.constant 1.562500e-02 : f32
    %14 = vector.broadcast %cst_8 : f32 to vector<8x1xf32>
    %15 = arith.mulf %11, %14 : vector<8x1xf32>
    %16 = arith.mulf %13, %13 : vector<8x1xf32>
    %17 = arith.subf %15, %16 : vector<8x1xf32>
    %cst_9 = arith.constant 9.99999974E-6 : f32
    %18 = vector.broadcast %cst_9 : f32 to vector<8x1xf32>
    %19 = arith.addf %17, %18 : vector<8x1xf32>
    %20 = math.rsqrt %19 : vector<8x1xf32>
    %21 = vector.broadcast %13 : vector<8x1xf32> to vector<8x128xf32>
    %22 = arith.subf %6, %21 : vector<8x128xf32>
    %23 = vector.broadcast %20 : vector<8x1xf32> to vector<8x128xf32>
    %24 = arith.mulf %22, %23 : vector<8x128xf32>
    %25 = vector.extract_strided_slice %3 {offsets = [1, 0], sizes = [1, 128], strides = [1, 1]} : vector<3x128xf32> to vector<1x128xf32>
    %26 = vector.broadcast %25 : vector<1x128xf32> to vector<8x128xf32>
    %27 = arith.mulf %24, %26 : vector<8x128xf32>
    %28 = vector.extract_strided_slice %3 {offsets = [2, 0], sizes = [1, 128], strides = [1, 1]} : vector<3x128xf32> to vector<1x128xf32>
    %29 = vector.broadcast %28 : vector<1x128xf32> to vector<8x128xf32>
    %30 = arith.addf %27, %29 : vector<8x128xf32>
    %cst_10 = arith.constant 5.000000e-01 : f32
    %31 = vector.broadcast %cst_10 : f32 to vector<8x128xf32>
    %32 = arith.mulf %31, %30 : vector<8x128xf32>
    %cst_11 = arith.constant 0.707106769 : f32
    %33 = vector.broadcast %cst_11 : f32 to vector<8x128xf32>
    %34 = arith.mulf %30, %33 : vector<8x128xf32>
    %35 = math.erf %34 : vector<8x128xf32>
    %cst_12 = arith.constant 1.000000e+00 : f32
    %36 = vector.broadcast %cst_12 : f32 to vector<8x128xf32>
    %37 = arith.addf %36, %35 : vector<8x128xf32>
    %38 = arith.mulf %32, %37 : vector<8x128xf32>
    %c0_13 = arith.constant 0 : index
    %c0_14 = arith.constant 0 : index
    %39 = vector.load %arg4[%c0_13, %c0_14] : memref<8x128xf32, #tpu.memory_space<vmem>>, vector<8x128xf32>
    tpu.vector_store %arg4[%c0_13, %c0_14], %38 {strides = array<i32>} : memref<8x128xf32, #tpu.memory_space<vmem>>, vector<8x128xf32>,
    return
  }
  func.func @transform_0(%arg0: i32) -> (i32, i32) {
    %c0_i32 = arith.constant 0 : i32
    %c0_i32_0 = arith.constant 0 : i32
    return %arg0, %c0_i32 : i32, i32
  }
  func.func @transform_1(%arg0: i32) -> (i32, i32) {
    %c0_i32 = arith.constant 0 : i32
    %c0_i32_0 = arith.constant 0 : i32
    %c0_i32_1 = arith.constant 0 : i32
    return %c0_i32, %c0_i32_0 : i32, i32
  }
  func.func @transform_2(%arg0: i32) -> (i32, i32) {
    %c0_i32 = arith.constant 0 : i32
    %c0_i32_0 = arith.constant 0 : i32
    %c0_i32_1 = arith.constant 0 : i32
    return %c0_i32, %c0_i32_0 : i32, i32
  }
  func.func @transform_3(%arg0: i32) -> (i32, i32) {
    %c0_i32 = arith.constant 0 : i32
    %c0_i32_0 = arith.constant 0 : i32
    return %arg0, %c0_i32 : i32, i32
  }
}

</mosaic_0001>

<bundles_post_ra>
// kernel: mlp_block.1
= control target key start
LH: loop header
LB: loop body
LE: loop exit
PB: predicated region body
PF: predicated region fallthrough
CT: control target
= control target key end

     0   :  { %v188_v1 = vmov 0.0   ;;  %vm189_vm0 = vmmov 0   ;;  %s232_s0 = inlined_call_operand.vmem [shape: f32[8,32], index: 0, kind: input, shape index: {}]   ;;  %s233_s1 = inlined_call_operand.vmem [shape: f32[32,128], index: 1, kind: input, shape index: {}]   ;;  %s234_s2 = inlined_call_operand.vmem [shape: f32[3,128], index: 2, kind: input, shape index: {}]   ;;  %s235_s3 = inlined_call_operand.hbm [shape: f32[8,128], index: 3, kind: output, shape index: {}]  }
   0x1   :  { %v19_v0 = vld [vmem:[%s233_s1 + $0x18] sm:$0xff]  ;;  %148 = vmatprep.subr.mxu0 %v188_v1  ;;  %v18_v2 = vld [vmem:[%s233_s1 + $0x10] sm:$0xff]  ;;  %156 = vmatprep.mubr.msk.f32.mxu0 %vm189_vm0, %v188_v1 }
   0x2   :  { %149 = vmatpush3.msra.mxu0 %v19_v0 }
   0x3   :  { %8 = vsyncpa [#allocation3], 0  ;;  %150 = vmatprep.subr.mxu0 %v188_v1  ;;  %v17_v3 = vld [vmem:[%s233_s1 + $0x8] sm:$0xff]  ;;  %v16_v4 = vld [vmem:[%s233_s1] sm:$0xff]  ;;  %vm25_vm1 = vcmask 261120   ;;  %v21_v6 = vlaneseq }
   0x4   :  { %151 = vmatpush3.msra.mxu0 %v18_v2  ;;  %v15_v5 = vld [vmem:[%s232_s0] sm:$0xff]  ;;  %s190_s0 = smov [#allocation2]  }
   0x5   :  { %152 = vmatprep.subr.mxu0 %v188_v1  ;;  %v22_v7 = vshrl.u32 %v21_v6, 7  ;;  %v20_v9 = vld [vmem:[%s234_s2] sm:$0x7]  ;;  %s134_s1 = sshll.u32 %s190_s0, 4  ;;  %s135_s1 = int_to_ptr.vmem [resolvable:$true] %s134_s1 }
   0x6   :  { %153 = vmatpush3.msra.mxu0 %v17_v3  ;;  %s166_s2 = scalar_lea.vmem %s135_s1, 128  ;;  %p171_p1 = scmp.lt.s32.totalorder %s135_s1, %s135_s1 }
   0x7   :  { %154 = vmatprep.subr.mxu0 %v188_v1  ;;  %v23_v8 = vsub.s32 0, %v22_v7  ;;  %v114_v22 = vsub.s32 1, %v22_v7  ;;  %v119_v23 = vsub.s32 2, %v22_v7  ;;  %p167_p0 = scmp.ne.s32.totalorder %s135_s1, %s166_s2  ;;  %p172_p2 = scmp.lt.s32.totalorder %s166_s2, %s166_s2 }
   0x8   :  { %155 = vmatpush3.msra.mxu0 %v16_v4 }
   0x9   :  { %157 = vmatmul.mubr.msk.f32.vlgmr.msra.gmra.mxu0 %vm25_vm1, %v15_v5  ;;  %v24_v10 = vrot.slane %v20_v9, %v23_v8  ;;  %v115_v24 = vrot.slane %v20_v9, %v114_v22  ;;  %v120_v27 = vrot.slane %v20_v9, %v119_v23  ;;  %p173_p3 = por %p172_p2, %p171_p1 }
   0xb   :  { %p174_p4 = pnand %p173_p3, %p167_p0 }
  0xc9   :  { %v95_v11 = vpop.f32.mrf.mxu0 }
  0xca   :  { %v96_v12 = vadd.f32 %v95_v11, %v24_v10 }
  0xcb   :  { %v158_v13 = vpop.f32.mrf.mxu0 }
  0xcc   :  { %99 = vadd.xlane.f32.xlu0 %v96_v12  ;;  %v101_v14 = vmul.f32 %v96_v12, %v96_v12 }
  0xd0   :  { %102 = vadd.xlane.f32.xlu0 %v101_v14 }
 0x155   :  { %v100_v15 = vpop.xlane.xlu0 %99 }
 0x156   :  { %v104_v16 = vmul.f32 0.015625, %v100_v15 }
 0x158   :  { %v106_v18 = vmul.f32 %v104_v16, %v104_v16  ;;  %v110_v25 = vsub.f32 %v96_v12, %v104_v16 }
 0x159   :  { %v103_v17 = vpop.xlane.xlu0 %102 }
 0x15a   :  { %v105_v19 = vmul.f32 0.015625, %v103_v17 }
 0x15c   :  { %v107_v20 = vsub.f32 %v105_v19, %v106_v18 }
 0x15e   :  { %v108_v21 = vadd.f32 1e-05, %v107_v20 }
 0x160   :  { %162 = vrsqrt.f32 %v108_v21 }
 0x16d   :  { %v163_v26 = vpop.eup %162 }
 0x16e   :  { %v111_v28 = vmul.f32 %v163_v26, %v110_v25 }
 0x170   :  { %v116_v29 = vmul.f32 %v115_v24, %v111_v28 }
 0x172   :  { %v121_v30 = vadd.f32 %v120_v27, %v116_v29 }
 0x174   :  { %v123_v31 = vmul.f32 0.70710677, %v121_v30  ;;  %v122_v33 = vmul.f32 0.5, %v121_v30 }
 0x176   :  { %164 = verf.f32 %v123_v31 }
 0x183   :  { %v165_v32 = vpop.eup %164 }
 0x184   :  { %v125_v34 = vadd.f32 1.0, %v165_v32 }
 0x186   :  { %v126_v35 = vmul.f32 %v125_v34, %v122_v33 }
 0x188   :  { %127 = vst [vmem:[#allocation2] sm:$0xff] %v126_v35 }
 0x189   :  { %177 = shalt.err (!%p174_p4)
}
 0x18a   :  { %137 = dma.vmem_to_hbm [thread:$0]  %s135_s1, 128, %s235_s3, [#allocation3]  }
 0x18b   :  { %186 = dma.done.wait [#allocation3], 128  }
 0x18c   :  { %187 = vsyncadd [#allocation3], 4294967168 }
 0x18d   :  { %141 = vsyncpa [#allocation3], 1 }

</bundles_post_ra>
